<compile_context>
chip_gen: v7x
topology: tpu7x:2x2x1
jax: 0.10.0
libtpu: 0.0.40
codegen_flags: <defaults>
</compile_context>

<pallas_src>
import functools

import numpy as np

import jax
import jax.numpy as jnp
from jax import lax
from jax.experimental import pallas as pl
from jax.experimental.pallas import tpu as pltpu


# ------------------------ roll-direction self check ---------------------------

@functools.cache
def _roll_matches_jnp() -> bool:
    """pltpu.roll is documented to match jnp.roll (result[i] = x[i - shift]).
    Verify the rotation direction once on the real backend so the conv tap
    shifts always use the correct sign."""
    def probe(x_ref, o_ref):
        o_ref[...] = pltpu.roll(x_ref[...], 1, axis=1)

    x = lax.broadcasted_iota(jnp.float32, (8, 128), 1)
    y = pl.pallas_call(
        probe,
        out_shape=jax.ShapeDtypeStruct((8, 128), jnp.float32),
        in_specs=[pl.BlockSpec(memory_space=pltpu.MemorySpace.VMEM)],
        out_specs=pl.BlockSpec(memory_space=pltpu.MemorySpace.VMEM),
    )(x)
    return bool(y[0, 0] == 127.0)


# ------------------------------ host-side helpers ------------------------------

@functools.cache
def _border_masks_host(H, W):
    """(9, H*W) {0,1} f32 masks, one row per tap (kh-major, kw), built once on host."""
    HW = H * W
    p = np.arange(HW)
    hh, ww = p // W, p % W
    rows = []
    for dy in (-1, 0, 1):
        for dx in (-1, 0, 1):
            ok = (hh + dy >= 0) & (hh + dy < H) & (ww + dx >= 0) & (ww + dx < W)
            rows.append(ok)
    return np.stack(rows).astype(np.float32)


@functools.cache
def _vmem_capacity():
    try:
        return int(pltpu.get_tpu_info().vmem_capacity_bytes)
    except Exception:
        return 64 * 1024 * 1024            # conservative fallback (v7x-sized)


def _vmem_limit_bytes():
    # v7x (64 MiB/TC) -> ~32 MiB scoped; v5e/v6e (128 MiB) can afford more.
    return int(min(_vmem_capacity() // 2, 96 * 1024 * 1024))


def _choose_nb(N, C, HW, bf16_taps):
    """Images per grid step: fill a conservative VMEM budget, prefer an even grid
    length (v7x has 2 TensorCores), and require Nb | N."""
    budget = min(_vmem_capacity() // 4, 24 * 1024 * 1024)
    col_bytes = 9 * C * HW * (2 if bf16_taps else 4)
    per_img = 2 * 2 * C * HW * 4 + col_bytes + 4 * C * HW * 4   # dbuf in/out + col + temps
    max_nb = max(1, min(8, budget // max(per_img, 1)))
    divs = [d for d in range(1, N + 1) if N % d == 0 and d <= max_nb]
    even = [d for d in divs if (N // d) % 2 == 0]
    return max(even) if even else max(divs)


def _tap_shifts(H, W, roll_like_jnp):
    """Static lane-roll amounts for the 9 conv taps, in (kh, kw) order."""
    HW = H * W
    shifts = []
    for dy in (-1, 0, 1):            # kh = dy + 1
        for dx in (-1, 0, 1):        # kw = dx + 1
            off = dy * W + dx
            shifts.append(((-off) if roll_like_jnp else off) % HW)
    return shifts


# ----------------------------- in-kernel helpers ------------------------------

def _group_norm_2d(x, gamma, beta, groups, eps=1e-5):
    """x: (C, HW) f32; gamma/beta: (C, 1). PyTorch GroupNorm (biased var),
    one-pass statistics (sum, sum of squares) + single fused scale/shift pass."""
    C, HW = x.shape
    cpg = C // groups
    denom = float(cpg * HW)

    s1 = jnp.sum(x, axis=1, keepdims=True)            # (C, 1)
    s2 = jnp.sum(x * x, axis=1, keepdims=True)        # (C, 1)

    def per_group(ch_sums):                            # per-channel -> per-group sums
        if cpg == 1:
            return ch_sums
        g = jnp.sum(ch_sums.reshape(groups, cpg), axis=1, keepdims=True)
        return jnp.broadcast_to(g, (groups, cpg)).reshape(C, 1)

    mean = per_group(s1) / denom
    var = per_group(s2) / denom - mean * mean
    scale = lax.rsqrt(var + eps) * gamma               # (C, 1)
    shift = beta - mean * scale                        # (C, 1)
    return x * scale + shift                           # single fused pass


def _conv3x3_im2col(x, w, bmap, masks, shifts, bf16_taps):
    """x: (C, HW) f32; w: (Cout, 9*C) bf16; bmap: (Cout, HW) f32 (bias incl. t-channel);
    masks: (9, HW) f32 {0,1}.  One im2col matmul on the MXU per conv."""
    cols = []
    for ti, shift in enumerate(shifts):
        s = x if shift == 0 else pltpu.roll(x, shift, axis=1)   # XLU lane rotation
        if ti != 4:                                             # center tap needs no mask
            s = s * masks[ti:ti + 1, :]                         # border zeroing (f32 VPU)
        if bf16_taps:
            s = s.astype(jnp.bfloat16)                          # halves live col data
        cols.append(s)
    col = jnp.concatenate(cols, axis=0)                         # (9*C, HW)
    if not bf16_taps:
        col = col.astype(jnp.bfloat16)
    y = jnp.dot(w, col, preferred_element_type=jnp.float32)     # single bf16 MXU pass
    return y + bmap


# --------------------------------- kernel -------------------------------------

def odefunc_kernel(x_ref, masks_ref,
                   g1w_ref, g1b_ref, w1_ref, b1_ref,
                   g2w_ref, g2b_ref, w2_ref, b2_ref,
                   g3w_ref, g3b_ref,
                   out_ref, *, groups, H, W, nb, roll_like_jnp, bf16_taps):
    shifts = _tap_shifts(H, W, roll_like_jnp)         # shared by both convs
    masks = masks_ref[...]                            # (9, HW) f32, loaded once
    g1w, g1b = g1w_ref[...], g1b_ref[...]
    g2w, g2b = g2w_ref[...], g2b_ref[...]
    g3w, g3b = g3w_ref[...], g3b_ref[...]
    w1, b1 = w1_ref[...], b1_ref[...]
    w2, b2 = w2_ref[...], b2_ref[...]

    # Static per-image loop: Nb independent dependency chains per grid step,
    # amortizing grid/DMA overhead and letting the scheduler interleave them.
    for n in range(nb):
        x = x_ref[n].astype(jnp.float32)                              # (C, HW)
        out = _group_norm_2d(x, g1w, g1b, groups)                     # norm1
        out = jnp.maximum(out, 0.0)                                   # relu
        out = _conv3x3_im2col(out, w1, b1, masks, shifts, bf16_taps)  # conv1 (+t bias)
        out = _group_norm_2d(out, g2w, g2b, groups)                   # norm2
        out = jnp.maximum(out, 0.0)                                   # relu
        out = _conv3x3_im2col(out, w2, b2, masks, shifts, bf16_taps)  # conv2 (+t bias)
        out = _group_norm_2d(out, g3w, g3b, groups)                   # norm3
        out_ref[n] = out.astype(out_ref.dtype)


# -------------------------------- wrapper --------------------------------------

def odefunc_forward(t, x, params, *, nb=None):
    """x: (N, C, H, W) float32 (NCHW, like PyTorch). Returns (N, C, H, W)."""
    N, C, H, W = x.shape
    HW = H * W
    G = min(32, C)
    t = jnp.asarray(t, jnp.float32)

    bf16_taps = (C % 16 == 0)                 # at C=8 keep f32 taps (sublane alignment)
    masks_np = _border_masks_host(H, W)       # (9, HW) {0,1}
    masks = jnp.asarray(masks_np)

    def gn(v):                                # (C,) -> (C, 1), broadcasts against (C, HW)
        return v.reshape(C, 1)

    def split_conv(w, b):
        # w: (Cout, C+1, 3, 3) OIHW, channel 0 = concatenated time plane.
        # Closed-form t-channel bias (exact, incl. zero padding): 9 masked adds,
        # no XLA conv dispatch per solver stage.
        Cout = w.shape[0]
        wt = w[:, 0, :, :].reshape(Cout, 9).astype(jnp.float32)       # (kh, kw) order
        bmap = b.reshape(Cout, 1).astype(jnp.float32) + t * (wt @ masks)  # (Cout, HW)
        # column order = (kh, kw, cin) to match the tap order inside the kernel
        wmat = jnp.transpose(w[:, 1:], (0, 2, 3, 1)).reshape(Cout, 9 * C)
        return wmat.astype(jnp.bfloat16), bmap.astype(jnp.float32)

    w1m, b1m = split_conv(params["w1"], params["b1"])
    w2m, b2m = split_conv(params["w2"], params["b2"])

    if nb is None:
        nb = _choose_nb(N, C, HW, bf16_taps)
    assert N % nb == 0, "batch-per-step must divide N"

    kernel = functools.partial(odefunc_kernel, groups=G, H=H, W=W, nb=nb,
                               roll_like_jnp=_roll_matches_jnp(),
                               bf16_taps=bf16_taps)

    vmem = pl.BlockSpec(memory_space=pltpu.MemorySpace.VMEM)  # small resident operands
    blk = pl.BlockSpec((nb, C, HW), lambda n: (n, 0, 0))      # lane-dense batched block

    flops = int(N * (2 * (2 * C * 9 * C * HW) + 24 * C * HW))
    cost = pl.CostEstimate(
        flops=flops,
        transcendentals=int(3 * N * C),                       # rsqrt per channel per GN
        bytes_accessed=int(2 * N * C * HW * 4                 # x in + out
                           + 2 * (C * 9 * C * 2 + C * HW * 4) # weights + bias maps
                           + 9 * HW * 4 + 6 * C * 4))

    out = pl.pallas_call(
        kernel,
        out_shape=jax.ShapeDtypeStruct((N, C, HW), jnp.float32),
        grid=(N // nb,),
        in_specs=[blk, vmem,
                  vmem, vmem, vmem, vmem,
                  vmem, vmem, vmem, vmem,
                  vmem, vmem],
        out_specs=blk,
        compiler_params=pltpu.CompilerParams(
            dimension_semantics=("parallel",),                # 2 TCs on v7x
            vmem_limit_bytes=_vmem_limit_bytes(),             # per-generation scoped limit
        ),
        cost_estimate=cost,
    )(x.reshape(N, C, HW),
      masks,
      gn(params["g1w"]), gn(params["g1b"]), w1m, b1m,
      gn(params["g2w"]), gn(params["g2b"]), w2m, b2m,
      gn(params["g3w"]), gn(params["g3b"]))

    return out.reshape(N, C, H, W)


# ---------------------------- pure-JAX reference -------------------------------

def _ref_group_norm(x, g, b, G, eps=1e-5):
    N, C, H, W = x.shape
    xg = x.reshape(N, G, C // G, H, W)
    m = xg.mean(axis=(2, 3, 4), keepdims=True)
    v = ((xg - m) ** 2).mean(axis=(2, 3, 4), keepdims=True)
    xn = ((xg - m) * lax.rsqrt(v + eps)).reshape(N, C, H, W)
    return xn * g.reshape(1, C, 1, 1) + b.reshape(1, C, 1, 1)


def _ref_concat_conv(t, x, w, b):
    N, C, H, W = x.shape
    tt = jnp.full((N, 1, H, W), t, x.dtype)
    xx = jnp.concatenate([tt, x], axis=1)
    y = lax.conv_general_dilated(
        xx, w, window_strides=(1, 1), padding=((1, 1), (1, 1)),
        dimension_numbers=("NCHW", "OIHW", "NCHW"),
        precision=lax.Precision.HIGHEST)
    return y + b.reshape(1, -1, 1, 1)


def odefunc_reference(t, x, params):
    C = x.shape[1]
    G = min(32, C)
    out = _ref_group_norm(x, params["g1w"], params["g1b"], G)
    out = jnp.maximum(out, 0.0)
    out = _ref_concat_conv(t, out, params["w1"], params["b1"])
    out = _ref_group_norm(out, params["g2w"], params["g2b"], G)
    out = jnp.maximum(out, 0.0)
    out = _ref_concat_conv(t, out, params["w2"], params["b2"])
    out = _ref_group_norm(out, params["g3w"], params["g3b"], G)
    return out


# ----------------------------------- main --------------------------------------

if __name__ == "__main__":
    key = jax.random.PRNGKey(0)
    N, C, H, W = 4, 8, 16, 16        # dim = 8 -> GroupNorm(min(32, 8) = 8 groups, 8)
    ks = jax.random.split(key, 13)

    x = jax.random.normal(ks[0], (N, C, H, W), jnp.float32)
    t = jnp.float32(0.5)

    params = {
        "g1w": 1.0 + 0.1 * jax.random.normal(ks[1], (C,), jnp.float32),
        "g1b": 0.1 * jax.random.normal(ks[2], (C,), jnp.float32),
        "w1": 0.1 * jax.random.normal(ks[3], (C, C + 1, 3, 3), jnp.float32),
        "b1": 0.1 * jax.random.normal(ks[4], (C,), jnp.float32),
        "g2w": 1.0 + 0.1 * jax.random.normal(ks[5], (C,), jnp.float32),
        "g2b": 0.1 * jax.random.normal(ks[6], (C,), jnp.float32),
        "w2": 0.1 * jax.random.normal(ks[7], (C, C + 1, 3, 3), jnp.float32),
        "b2": 0.1 * jax.random.normal(ks[8], (C,), jnp.float32),
        "g3w": 1.0 + 0.1 * jax.random.normal(ks[9], (C,), jnp.float32),
        "g3b": 0.1 * jax.random.normal(ks[10], (C,), jnp.float32),
    }

    out = odefunc_forward(t, x, params)
    out = jax.block_until_ready(out)

    ref = odefunc_reference(t, x, params)
    assert out.shape == (N, C, H, W)
    max_err = float(jnp.max(jnp.abs(out - ref)))
    # Kernel conv matmuls run as a single bf16 MXU pass (per perf guidance); the
    # reference uses f32 Precision.HIGHEST, so allow bf16-level absolute error on
    # unit-scale GroupNorm outputs. Real semantic bugs produce errors >> 0.05.
    assert max_err < 5e-2, f"max abs error too large: {max_err}"

    print("KERNEL_OK")
</pallas_src>

<mosaic_0001>
module attributes {stable_mosaic.version = 11 : i64} {
  func.func @probe(%arg0: memref<8x128xf32, #tpu.memory_space<vmem>>, %arg1: memref<8x128xf32, #tpu.memory_space<vmem>>) attributes {dimension_semantics = [], scalar_prefetch = 0 : i64, scratch_operands = 0 : i64, tpu.core_type = #tpu.core_type<tc>} {
    %c0 = arith.constant 0 : index
    %c0_0 = arith.constant 0 : index
    %0 = vector.load %arg0[%c0, %c0_0] : memref<8x128xf32, #tpu.memory_space<vmem>>, vector<8x128xf32>
    %c1_i32 = arith.constant 1 : i32
    %1 = tpu.dynamic_rotate %0 by %c1_i32 dim 1 : vector<8x128xf32>, i32 -> vector<8x128xf32>
    %c0_1 = arith.constant 0 : index
    %c0_2 = arith.constant 0 : index
    %2 = vector.load %arg1[%c0_1, %c0_2] : memref<8x128xf32, #tpu.memory_space<vmem>>, vector<8x128xf32>
    tpu.vector_store %arg1[%c0_1, %c0_2], %1 {strides = array<i32>} : memref<8x128xf32, #tpu.memory_space<vmem>>, vector<8x128xf32>,
    return
  }
}

</mosaic_0001>

<bundles_post_ra>
// kernel: tpu_custom_call.1
= control target key start
LH: loop header
LB: loop body
LE: loop exit
PB: predicated region body
PF: predicated region fallthrough
CT: control target
= control target key end

     0   :  { %6 = vsyncpa [#allocation3], 0  ;;  %s128_s0 = inlined_call_operand.hbm [shape: f32[8,128], index: 0, kind: input, shape index: {}]   ;;  %s129_s1 = inlined_call_operand.hbm [shape: f32[8,128], index: 1, kind: output, shape index: {}]  }
   0x1   :  { %7 = vsyncpa [#allocation4], 0  ;;  %s91_s6 = smov [#allocation2]   ;;  %s43_s10 = scalar_lea.hbm %s128_s0, 128 }
   0x2   :  { %s14_s7 = sshll.u32 %s91_s6, 4  ;;  %p44_p0 = scmp.ne.s32.totalorder %s128_s0, %s43_s10  ;;  %s15_s7 = int_to_ptr.vmem [resolvable:$true] %s14_s7 }
   0x3   :  { %p47_p1 = scmp.lt.u32.totalorder %s43_s10, %s128_s0 }
   0x5   :  { %p49_p2 = pnand %p47_p1, %p44_p0 }
   0x7   :  { %52 = shalt.err (!%p49_p2)
}
   0x8   :  { %s53_s15 = scalar_lea.vmem %s15_s7, 128  ;;  %p58_p4 = scmp.lt.s32.totalorder %s15_s7, %s15_s7 }
   0x9   :  { %p54_p3 = scmp.ne.s32.totalorder %s15_s7, %s53_s15  ;;  %p59_p5 = scmp.lt.s32.totalorder %s53_s15, %s53_s15 }
   0xb   :  { %p60_p6 = por %p59_p5, %p58_p4 }
   0xd   :  { %p61_p7 = pnand %p60_p6, %p54_p3 }
   0xf   :  { %64 = shalt.err (!%p61_p7)
}
  0x10   :  { %17 = dma.hbm_to_vmem [thread:$0]  %s128_s0, 128, %s15_s7, [#allocation3]  }
  0x11   :  { %87 = dma.done.wait [#allocation3], 128  }
  0x12   :  { %88 = vsyncadd [#allocation3], 4294967168  ;;  %v21_v0 = vld [vmem:[#allocation2] sm:$0xff]  ;;  %s92_s18 = smov 1   ;;  %s93_s19 = smov [#allocation5]  }
  0x13   :  { %22 = vrot.lane.b32.xlu0 %v21_v0, %s92_s18  ;;  %s31_s20 = sshll.u32 %s93_s19, 4  ;;  %s32_s20 = int_to_ptr.vmem [resolvable:$true] %s31_s20 }
  0x14   :  { %s65_s21 = scalar_lea.vmem %s32_s20, 128  ;;  %p70_p9 = scmp.lt.s32.totalorder %s32_s20, %s32_s20 }
  0x15   :  { %p66_p8 = scmp.ne.s32.totalorder %s32_s20, %s65_s21  ;;  %p71_p10 = scmp.lt.s32.totalorder %s65_s21, %s65_s21 }
  0x17   :  { %p72_p11 = por %p71_p10, %p70_p9 }
  0x19   :  { %p73_p12 = pnand %p72_p11, %p66_p8 }
  0x85   :  { %v23_v1 = vpop.permute.xlu0 %22 }
  0x86   :  { %24 = vst [vmem:[#allocation5] sm:$0xff] %v23_v1 }
  0x87   :  { %76 = shalt.err (!%p73_p12)
}
  0x88   :  { %s77_s0 = scalar_lea.hbm %s129_s1, 128 }
  0x89   :  { %p78_p13 = scmp.ne.s32.totalorder %s129_s1, %s77_s0  ;;  %p81_p0 = scmp.lt.u32.totalorder %s77_s0, %s129_s1 }
  0x8b   :  { %p83_p1 = pnand %p81_p0, %p78_p13 }
  0x8d   :  { %86 = shalt.err (!%p83_p1)
}
  0x8e   :  { %34 = dma.vmem_to_hbm [thread:$0]  %s32_s20, 128, %s129_s1, [#allocation4]  }
  0x8f   :  { %89 = dma.done.wait [#allocation4], 128  }
  0x90   :  { %90 = vsyncadd [#allocation4], 4294967168 }
  0x91   :  { %38 = vsyncpa [#allocation3], 1 }
  0x92   :  { %39 = vsyncpa [#allocation4], 1 }

</bundles_post_ra>
